<compile_context>
chip_gen: v6e
topology: v6e:2x2x1
jax: 0.10.0
libtpu: 0.0.40
codegen_flags: <defaults>
</compile_context>

<pallas_src>
import functools
import math

import jax
import jax.numpy as jnp
from jax.experimental import pallas as pl
from jax.experimental.pallas import tpu as pltpu


def _matcher_kernel(x_ref, w_ref, b_ref, ty_ref, out_ref, *scratch,
                    num_k, inv_temperature, inv_sqrt_hd, use_norm,
                    matmul_dtype, reduce_on_lanes):
    # x_ref : (tm, tk)     w_ref : (tk, n_out)   b_ref : (1, n_out)
    # ty_ref: (tm, n_out)  out_ref: (1, tm)      scratch: [(tm, n_out) f32] if num_k > 1

    def partial_matmul():
        a = x_ref[...]
        wv = w_ref[...]
        if matmul_dtype is not None:
            # Optional (v5e): bf16 operands keep the MXU off the critical path
            # when x/W arrive as f32; f32 accumulation preserved below.
            a = a.astype(matmul_dtype)
            wv = wv.astype(matmul_dtype)
        return jnp.dot(a, wv, preferred_element_type=jnp.float32)

    def epilogue(tx_raw):
        tx = tx_raw + b_ref[...].astype(jnp.float32)        # (tm, n_out) f32
        ty = ty_ref[...].astype(jnp.float32)                 # (tm, n_out) f32
        eps2 = jnp.float32(1e-16)  # == torch per-norm eps=1e-8, applied on squared norms
        if reduce_on_lanes:
            # Row-major lane-axis reductions (no full-tile XLU transposes);
            # only the tiny (tm, 1) score vector is relayouted to (1, tm) so
            # the output store stays lane-dense.
            dot = jnp.sum(tx * ty, axis=-1, keepdims=True)   # (tm, 1)
            if use_norm:
                nx2 = jnp.maximum(jnp.sum(tx * tx, axis=-1, keepdims=True), eps2)
                nt2 = jnp.maximum(jnp.sum(ty * ty, axis=-1, keepdims=True), eps2)
                score = dot * jax.lax.rsqrt(nx2 * nt2) * jnp.float32(inv_temperature)
            else:
                score = dot * jnp.float32(inv_sqrt_hd)
            out_ref[...] = jnp.transpose(score)               # (1, tm)
        else:
            # Conservative fallback: full-tile transposes + sublane reductions
            # (previously validated structure).
            txT = tx.T
            tyT = ty.T
            dot = jnp.sum(txT * tyT, axis=0, keepdims=True)   # (1, tm)
            if use_norm:
                nx2 = jnp.maximum(jnp.sum(txT * txT, axis=0, keepdims=True), eps2)
                nt2 = jnp.maximum(jnp.sum(tyT * tyT, axis=0, keepdims=True), eps2)
                out_ref[...] = dot * jax.lax.rsqrt(nx2 * nt2) * jnp.float32(inv_temperature)
            else:
                out_ref[...] = dot * jnp.float32(inv_sqrt_hd)

    if num_k == 1:
        # Whole W resident: single MXU matmul, no accumulator scratch needed.
        epilogue(partial_matmul())
    else:
        acc_ref = scratch[0]
        k = pl.program_id(1)

        @pl.when(k == 0)
        def _():
            acc_ref[...] = jnp.zeros_like(acc_ref)

        acc_ref[...] += partial_matmul()

        @pl.when(k == pl.num_programs(1) - 1)
        def _():
            epilogue(acc_ref[...])


def _round_up(a, m):
    return ((a + m - 1) // m) * m


def _cdiv(a, b):
    return (a + b - 1) // b


def _vmem_capacity_bytes():
    try:
        return int(pltpu.get_tpu_info().vmem_capacity_bytes)
    except Exception:
        return 64 << 20   # conservative fallback (v7x per-TensorCore VMEM)


def _choose_tiling(N, n_hid, n_out, x_dtype, w_dtype, ty_dtype):
    """Pick (tm row tile, tk K tile, vmem_limit) from the actual chip's VMEM."""
    bx = jnp.dtype(x_dtype).itemsize
    bw = jnp.dtype(w_dtype).itemsize
    bt = jnp.dtype(ty_dtype).itemsize

    capacity = _vmem_capacity_bytes()
    budget = int(0.45 * capacity)        # working-set target (~29 MiB v7x, ~58 MiB v5e/v6e)
    w_budget = budget // 4               # what the W buffer(s) may occupy

    # --- K tiling of n_hid (W resident & single-buffered vs. streamed) ------
    if n_hid * n_out * bw <= w_budget:
        tk, w_bufs = n_hid, 1
    else:
        tk = None
        d = (n_hid // 128) * 128
        while d >= 128:
            # tk must divide n_hid (partial K blocks would add garbage into the
            # accumulator) and be a multiple of 128 (layout rule).
            if n_hid % d == 0 and 2 * d * n_out * bw <= w_budget:
                tk = d
                break
            d -= 128
        if tk is None:
            tk, w_bufs = n_hid, 1        # degenerate: no usable divisor; stretch vmem_limit
        else:
            w_bufs = 2                   # K block index changes -> double-buffered
    num_k = n_hid // tk

    # --- row tile ------------------------------------------------------------
    acc_row = n_out * 4 if num_k > 1 else 0                 # f32 tx accumulator
    per_row = 2 * tk * bx + 2 * n_out * bt + acc_row + 8    # x, ty, acc, out
    fixed = w_bufs * tk * n_out * bw + (512 << 10)          # W + bias/padding slack
    avail = max(budget - fixed, 128 * per_row)
    cap = max(128, (avail // per_row) // 128 * 128)
    # Target >= ~4 grid steps (>= 2 per TensorCore on v7x) before growing tm.
    want = min(max(_round_up(_cdiv(N, 4), 128), 256), 1024)
    tm = max(128, min(cap, want, _round_up(N, 128)))

    est = fixed + tm * per_row
    vmem_limit = int(min(max(int(1.25 * est) + (8 << 20), 32 << 20),
                         int(0.80 * capacity)))
    return tm, tk, vmem_limit


def matcher_forward(x, w, b, ty, *, temperature=0.1, use_norm=True,
                    tm=None, tk=None, matmul_dtype=None):
    """x:[N,n_hid], w:[n_hid,n_out] (= torch weight.T), b:[n_out], ty:[N,n_out] -> [N]."""
    N, n_hid = x.shape
    assert w.shape[0] == n_hid
    n_out = w.shape[1]
    assert ty.shape == (N, n_out)
    assert b.shape == (n_out,)

    auto_tm, auto_tk, vmem_limit = _choose_tiling(N, n_hid, n_out,
                                                  x.dtype, w.dtype, ty.dtype)
    tm = auto_tm if tm is None else max(128, _round_up(int(tm), 128))
    tk = auto_tk if tk is None else int(tk)
    # tk must divide n_hid and be a multiple of 128 (or the full n_hid).
    if tk != n_hid and (tk <= 0 or n_hid % tk != 0 or tk % 128 != 0):
        tk = n_hid
    num_k = n_hid // tk
    num_i = _cdiv(N, tm)
    n_lanes = num_i * tm      # kernel-allocated output padding (tiny); sliced to [:N]

    b2 = b.reshape(1, n_out)

    def run(single_buffer_consts, reduce_on_lanes):
        kernel = functools.partial(
            _matcher_kernel,
            num_k=num_k,
            inv_temperature=1.0 / float(temperature),
            inv_sqrt_hd=1.0 / math.sqrt(n_out),   # torch module: sqrt_hd = sqrt(n_out)
            use_norm=use_norm,
            matmul_dtype=matmul_dtype,
            reduce_on_lanes=reduce_on_lanes,
        )

        w_index = lambda i, k: (k, 0)
        b_index = lambda i, k: (0, 0)
        if single_buffer_consts:
            # Grid-invariant blocks: a second pipeline buffer is pure VMEM waste.
            b_spec = pl.BlockSpec((1, n_out), b_index, pipeline_mode=pl.Buffered(1))
            if num_k == 1:
                w_spec = pl.BlockSpec((tk, n_out), w_index, pipeline_mode=pl.Buffered(1))
            else:
                w_spec = pl.BlockSpec((tk, n_out), w_index)
        else:
            w_spec = pl.BlockSpec((tk, n_out), w_index)
            b_spec = pl.BlockSpec((1, n_out), b_index)

        scratch = [pltpu.VMEM((tm, n_out), jnp.float32)] if num_k > 1 else []

        return pl.pallas_call(
            kernel,
            out_shape=jax.ShapeDtypeStruct((1, n_lanes), jnp.float32),
            grid_spec=pltpu.PrefetchScalarGridSpec(
                num_scalar_prefetch=0,
                grid=(num_i, num_k),
                in_specs=[
                    pl.BlockSpec((tm, tk), lambda i, k: (i, k)),      # x rows / K slab
                    w_spec,                                           # W slab
                    b_spec,                                           # bias
                    pl.BlockSpec((tm, n_out), lambda i, k: (i, 0)),   # ty rows
                ],
                out_specs=pl.BlockSpec((1, tm), lambda i, k: (0, i)),  # lane-dense scores
                scratch_shapes=scratch,
            ),
            compiler_params=pltpu.CompilerParams(
                dimension_semantics=("parallel", "arbitrary"),
                vmem_limit_bytes=vmem_limit,
            ),
        )(x, w, b2, ty)

    # Primary: single-buffered constants + lane-axis reductions.  If this JAX
    # build rejects either (pipeline_mode / Buffered(1), or the (tm,1)->(1,tm)
    # relayout), fall back to the conservative, previously-validated structure.
    # (Fallback only triggers when called eagerly; errors surface at dispatch.)
    try:
        out = jax.block_until_ready(run(True, True))
    except Exception:
        out = jax.block_until_ready(run(False, False))
    return out[0, :N]


def _reference(x, w, b, ty, *, temperature=0.1, use_norm=True):
    tx = x.astype(jnp.float32) @ w.astype(jnp.float32) + b.astype(jnp.float32)
    tyf = ty.astype(jnp.float32)
    if use_norm:
        eps = 1e-8
        nx = jnp.maximum(jnp.linalg.norm(tx, axis=-1), eps)
        nt = jnp.maximum(jnp.linalg.norm(tyf, axis=-1), eps)
        return jnp.sum(tx * tyf, axis=-1) / (nx * nt) / temperature
    return jnp.sum(tx * tyf, axis=-1) / math.sqrt(w.shape[1])


if __name__ == "__main__":
    root = jax.random.PRNGKey(0)

    def check(case, N, n_hid, n_out, tol, **kw):
        kx, kty, kwm, kb = jax.random.split(jax.random.fold_in(root, case), 4)
        x = jax.random.normal(kx, (N, n_hid), dtype=jnp.float32)
        ty = jax.random.normal(kty, (N, n_out), dtype=jnp.float32)
        # Deterministic Linear(n_hid, n_out) params; W stored as [n_hid, n_out] (= weight.T).
        bound = 1.0 / math.sqrt(n_hid)
        w = jax.random.uniform(kwm, (n_hid, n_out), jnp.float32, -bound, bound)
        b = jax.random.uniform(kb, (n_out,), jnp.float32, -bound, bound)
        for use_norm in (True, False):
            out = jax.block_until_ready(
                matcher_forward(x, w, b, ty, temperature=0.1, use_norm=use_norm, **kw))
            ref = _reference(x, w, b, ty, temperature=0.1, use_norm=use_norm)
            assert out.shape == (N,)
            assert jnp.allclose(out, ref, atol=tol, rtol=tol), (
                case, use_norm, float(jnp.max(jnp.abs(out - ref))))

    # Small shapes consistent with the module: 8 node pairs, n_hid=32 -> n_out=16.
    check(0, N=8, n_hid=32, n_out=16, tol=1e-4)
    # Exercise the ragged last row tile (200 % 128 != 0, no wrapper padding) and
    # the K-tiled accumulator path (n_hid=256 split into two 128-wide K slabs).
    check(1, N=200, n_hid=256, n_out=128, tol=2e-2, tm=128, tk=128)

    print("KERNEL_OK")
</pallas_src>

<mosaic_0001>
module attributes {stable_mosaic.version = 11 : i64} {
  func.func @_matcher_kernel(%arg0: i32, %arg1: i32, %arg2: memref<128x32xf32, #tpu.memory_space<vmem>>, %arg3: memref<32x16xf32, #tpu.memory_space<vmem>>, %arg4: memref<1x16xf32, #tpu.memory_space<vmem>>, %arg5: memref<128x16xf32, #tpu.memory_space<vmem>>, %arg6: memref<1x128xf32, #tpu.memory_space<vmem>>) attributes {dimension_semantics = [#tpu.dimension_semantics<parallel>, #tpu.dimension_semantics<arbitrary>], iteration_bounds = array<i64: 1, 1>, scalar_prefetch = 0 : i64, scratch_operands = 0 : i64, tpu.core_type = #tpu.core_type<tc>, window_params = [{transform_indices = @transform_0, window_bounds = array<i64: 128, 32>}, {pipeline_mode = #tpu.pipeline_mode<synchronous>, transform_indices = @transform_1, window_bounds = array<i64: 32, 16>}, {pipeline_mode = #tpu.pipeline_mode<synchronous>, transform_indices = @transform_2, window_bounds = array<i64: 1, 16>}, {transform_indices = @transform_3, window_bounds = array<i64: 128, 16>}, {transform_indices = @transform_4, window_bounds = array<i64: 1, 128>}]} {
    %c0 = arith.constant 0 : index
    %c0_0 = arith.constant 0 : index
    %0 = vector.load %arg2[%c0, %c0_0] : memref<128x32xf32, #tpu.memory_space<vmem>>, vector<128x32xf32>
    %c0_1 = arith.constant 0 : index
    %c0_2 = arith.constant 0 : index
    %1 = vector.load %arg3[%c0_1, %c0_2] : memref<32x16xf32, #tpu.memory_space<vmem>>, vector<32x16xf32>
    %cst = arith.constant dense<0.000000e+00> : vector<128x16xf32>
    %2 = tpu.matmul %0, %1, %cst {dimension_numbers = #tpu.dot_dimension_numbers<[1], [0], [0], [1], [0, 0, 1, 1], [], []>} : vector<128x32xf32>, vector<32x16xf32>, vector<128x16xf32> -> vector<128x16xf32>
    %c0_3 = arith.constant 0 : index
    %c0_4 = arith.constant 0 : index
    %3 = vector.load %arg4[%c0_3, %c0_4] : memref<1x16xf32, #tpu.memory_space<vmem>>, vector<1x16xf32>
    %4 = vector.broadcast %3 : vector<1x16xf32> to vector<128x16xf32>
    %5 = arith.addf %2, %4 : vector<128x16xf32>
    %c0_5 = arith.constant 0 : index
    %c0_6 = arith.constant 0 : index
    %6 = vector.load %arg5[%c0_5, %c0_6] : memref<128x16xf32, #tpu.memory_space<vmem>>, vector<128x16xf32>
    %7 = arith.mulf %5, %6 : vector<128x16xf32>
    %cst_7 = arith.constant dense<0.000000e+00> : vector<128xf32>
    %8 = vector.multi_reduction <add>, %7, %cst_7 [1] : vector<128x16xf32> to vector<128xf32>
    %9 = vector.shape_cast %8 : vector<128xf32> to vector<128x1xf32>
    %10 = arith.mulf %5, %5 : vector<128x16xf32>
    %cst_8 = arith.constant dense<0.000000e+00> : vector<128xf32>
    %11 = vector.multi_reduction <add>, %10, %cst_8 [1] : vector<128x16xf32> to vector<128xf32>
    %12 = vector.shape_cast %11 : vector<128xf32> to vector<128x1xf32>
    %cst_9 = arith.constant 1.000000e-16 : f32
    %13 = vector.broadcast %cst_9 : f32 to vector<128x1xf32>
    %14 = arith.maximumf %12, %13 : vector<128x1xf32>
    %15 = arith.mulf %6, %6 : vector<128x16xf32>
    %cst_10 = arith.constant dense<0.000000e+00> : vector<128xf32>
    %16 = vector.multi_reduction <add>, %15, %cst_10 [1] : vector<128x16xf32> to vector<128xf32>
    %17 = vector.shape_cast %16 : vector<128xf32> to vector<128x1xf32>
    %cst_11 = arith.constant 1.000000e-16 : f32
    %18 = vector.broadcast %cst_11 : f32 to vector<128x1xf32>
    %19 = arith.maximumf %17, %18 : vector<128x1xf32>
    %20 = arith.mulf %14, %19 : vector<128x1xf32>
    %21 = math.rsqrt %20 : vector<128x1xf32>
    %22 = arith.mulf %9, %21 : vector<128x1xf32>
    %cst_12 = arith.constant 1.000000e+01 : f32
    %23 = vector.broadcast %cst_12 : f32 to vector<128x1xf32>
    %24 = arith.mulf %22, %23 : vector<128x1xf32>
    %25 = tpu.transpose %24, [1, 0] : vector<128x1xf32> -> vector<1x128xf32>
    %c0_13 = arith.constant 0 : index
    %c0_14 = arith.constant 0 : index
    %26 = vector.load %arg6[%c0_13, %c0_14] : memref<1x128xf32, #tpu.memory_space<vmem>>, vector<1x128xf32>
    tpu.vector_store %arg6[%c0_13, %c0_14], %25 {strides = array<i32>} : memref<1x128xf32, #tpu.memory_space<vmem>>, vector<1x128xf32>,
    return
  }
  func.func @transform_0(%arg0: i32, %arg1: i32) -> (i32, i32) {
    %c0_i32 = arith.constant 0 : i32
    return %arg0, %arg1 : i32, i32
  }
  func.func @transform_1(%arg0: i32, %arg1: i32) -> (i32, i32) {
    %c0_i32 = arith.constant 0 : i32
    %c0_i32_0 = arith.constant 0 : i32
    return %arg1, %c0_i32 : i32, i32
  }
  func.func @transform_2(%arg0: i32, %arg1: i32) -> (i32, i32) {
    %c0_i32 = arith.constant 0 : i32
    %c0_i32_0 = arith.constant 0 : i32
    %c0_i32_1 = arith.constant 0 : i32
    return %c0_i32, %c0_i32_0 : i32, i32
  }
  func.func @transform_3(%arg0: i32, %arg1: i32) -> (i32, i32) {
    %c0_i32 = arith.constant 0 : i32
    %c0_i32_0 = arith.constant 0 : i32
    return %arg0, %c0_i32 : i32, i32
  }
  func.func @transform_4(%arg0: i32, %arg1: i32) -> (i32, i32) {
    %c0_i32 = arith.constant 0 : i32
    %c0_i32_0 = arith.constant 0 : i32
    return %c0_i32, %arg0 : i32, i32
  }
}

module attributes {stable_mosaic.version = 11 : i64} {
  func.func @_matcher_kernel(%arg0: i32, %arg1: i32, %arg2: memref<128x32xf32, #tpu.memory_space<vmem>>, %arg3: memref<32x16xf32, #tpu.memory_space<vmem>>, %arg4: memref<1x16xf32, #tpu.memory_space<vmem>>, %arg5: memref<128x16xf32, #tpu.memory_space<vmem>>, %arg6: memref<1x128xf32, #tpu.memory_space<vmem>>) attributes {dimension_semantics = [#tpu.dimension_semantics<parallel>, #tpu.dimension_semantics<arbitrary>], iteration_bounds = array<i64: 1, 1>, scalar_prefetch = 0 : i64, scratch_operands = 0 : i64, tpu.core_type = #tpu.core_type<tc>, window_params = [{transform_indices = @transform_0, window_bounds = array<i64: 128, 32>}, {transform_indices = @transform_1, window_bounds = array<i64: 32, 16>}, {pipeline_mode = #tpu.pipeline_mode<synchronous>, transform_indices = @transform_2, window_bounds = array<i64: 1, 16>}, {transform_indices = @transform_3, window_bounds = array<i64: 128, 16>}, {transform_indices = @transform_4, window_bounds = array<i64: 1, 128>}]} {
    %c0 = arith.constant 0 : index
    %c0_0 = arith.constant 0 : index
    %0 = vector.load %arg2[%c0, %c0_0] : memref<128x32xf32, #tpu.memory_space<vmem>>, vector<128x32xf32>
    %c0_1 = arith.constant 0 : index
    %c0_2 = arith.constant 0 : index
    %1 = vector.load %arg3[%c0_1, %c0_2] : memref<32x16xf32, #tpu.memory_space<vmem>>, vector<32x16xf32>
    %cst = arith.constant dense<0.000000e+00> : vector<128x16xf32>
    %2 = tpu.matmul %0, %1, %cst {dimension_numbers = #tpu.dot_dimension_numbers<[1], [0], [0], [1], [0, 0, 1, 1], [], []>} : vector<128x32xf32>, vector<32x16xf32>, vector<128x16xf32> -> vector<128x16xf32>
    %c0_3 = arith.constant 0 : index
    %c0_4 = arith.constant 0 : index
    %3 = vector.load %arg4[%c0_3, %c0_4] : memref<1x16xf32, #tpu.memory_space<vmem>>, vector<1x16xf32>
    %4 = vector.broadcast %3 : vector<1x16xf32> to vector<128x16xf32>
    %5 = arith.addf %2, %4 : vector<128x16xf32>
    %c0_5 = arith.constant 0 : index
    %c0_6 = arith.constant 0 : index
    %6 = vector.load %arg5[%c0_5, %c0_6] : memref<128x16xf32, #tpu.memory_space<vmem>>, vector<128x16xf32>
    %7 = tpu.transpose %5, [1, 0] : vector<128x16xf32> -> vector<16x128xf32>
    %8 = tpu.transpose %6, [1, 0] : vector<128x16xf32> -> vector<16x128xf32>
    %9 = arith.mulf %7, %8 : vector<16x128xf32>
    %cst_7 = arith.constant dense<0.000000e+00> : vector<128xf32>
    %10 = vector.multi_reduction <add>, %9, %cst_7 [0] : vector<16x128xf32> to vector<128xf32>
    %11 = vector.shape_cast %10 : vector<128xf32> to vector<1x128xf32>
    %12 = arith.mulf %7, %7 : vector<16x128xf32>
    %cst_8 = arith.constant dense<0.000000e+00> : vector<128xf32>
    %13 = vector.multi_reduction <add>, %12, %cst_8 [0] : vector<16x128xf32> to vector<128xf32>
    %14 = vector.shape_cast %13 : vector<128xf32> to vector<1x128xf32>
    %cst_9 = arith.constant 1.000000e-16 : f32
    %15 = vector.broadcast %cst_9 : f32 to vector<1x128xf32>
    %16 = arith.maximumf %14, %15 : vector<1x128xf32>
    %17 = arith.mulf %8, %8 : vector<16x128xf32>
    %cst_10 = arith.constant dense<0.000000e+00> : vector<128xf32>
    %18 = vector.multi_reduction <add>, %17, %cst_10 [0] : vector<16x128xf32> to vector<128xf32>
    %19 = vector.shape_cast %18 : vector<128xf32> to vector<1x128xf32>
    %cst_11 = arith.constant 1.000000e-16 : f32
    %20 = vector.broadcast %cst_11 : f32 to vector<1x128xf32>
    %21 = arith.maximumf %19, %20 : vector<1x128xf32>
    %22 = arith.mulf %16, %21 : vector<1x128xf32>
    %23 = math.rsqrt %22 : vector<1x128xf32>
    %24 = arith.mulf %11, %23 : vector<1x128xf32>
    %cst_12 = arith.constant 1.000000e+01 : f32
    %25 = vector.broadcast %cst_12 : f32 to vector<1x128xf32>
    %26 = arith.mulf %24, %25 : vector<1x128xf32>
    %c0_13 = arith.constant 0 : index
    %c0_14 = arith.constant 0 : index
    %27 = vector.load %arg6[%c0_13, %c0_14] : memref<1x128xf32, #tpu.memory_space<vmem>>, vector<1x128xf32>
    tpu.vector_store %arg6[%c0_13, %c0_14], %26 {strides = array<i32>} : memref<1x128xf32, #tpu.memory_space<vmem>>, vector<1x128xf32>,
    return
  }
  func.func @transform_0(%arg0: i32, %arg1: i32) -> (i32, i32) {
    %c0_i32 = arith.constant 0 : i32
    return %arg0, %arg1 : i32, i32
  }
  func.func @transform_1(%arg0: i32, %arg1: i32) -> (i32, i32) {
    %c0_i32 = arith.constant 0 : i32
    %c0_i32_0 = arith.constant 0 : i32
    return %arg1, %c0_i32 : i32, i32
  }
  func.func @transform_2(%arg0: i32, %arg1: i32) -> (i32, i32) {
    %c0_i32 = arith.constant 0 : i32
    %c0_i32_0 = arith.constant 0 : i32
    %c0_i32_1 = arith.constant 0 : i32
    return %c0_i32, %c0_i32_0 : i32, i32
  }
  func.func @transform_3(%arg0: i32, %arg1: i32) -> (i32, i32) {
    %c0_i32 = arith.constant 0 : i32
    %c0_i32_0 = arith.constant 0 : i32
    return %arg0, %c0_i32 : i32, i32
  }
  func.func @transform_4(%arg0: i32, %arg1: i32) -> (i32, i32) {
    %c0_i32 = arith.constant 0 : i32
    %c0_i32_0 = arith.constant 0 : i32
    return %c0_i32, %arg0 : i32, i32
  }
}

</mosaic_0001>

<bundles_post_ra>
// kernel: tpu_custom_call.1
= control target key start
LH: loop header
LB: loop body
LE: loop exit
PB: predicated region body
PF: predicated region fallthrough
CT: control target
= control target key end

     0   :  { %vm45_vm0 = vcmask 261120   ;;  %vm271_vm1 = vcmask 130048   ;;  %s1072_s0 = inlined_call_operand.vmem [shape: f32[8,32], index: 0, kind: input, shape index: {}]   ;;  %s1073_s1 = inlined_call_operand.vmem [shape: f32[32,16], index: 1, kind: input, shape index: {}]   ;;  %s1074_s2 = inlined_call_operand.vmem [shape: f32[1,16], index: 2, kind: input, shape index: {}]   ;;  %s1075_s3 = inlined_call_operand.vmem [shape: f32[8,16], index: 3, kind: input, shape index: {}]   ;;  %s1076_s4 = inlined_call_operand.hbm [shape: f32[1,128], index: 4, kind: output, shape index: {}]  }
   0x1   :  { %v37_v0 = vld [vmem:[%s1073_s1 + $0x18] sm:$0xff]  ;;  %v36_v1 = vld [vmem:[%s1073_s1 + $0x10] sm:$0xff]  ;;  %v35_v2 = vld [vmem:[%s1073_s1 + $0x8] sm:$0xff] }
   0x2   :  { %628 = vmatprep.subr.mxu0 %v37_v0  ;;  %660 = vmatprep.subr.mxu1 %v37_v0  ;;  %v34_v3 = vld [vmem:[%s1073_s1] sm:$0xff]  ;;  %v19_v5 = vld [vmem:[%s1072_s0 + $0x8] sm:$0xff]  ;;  %v20_v8 = vld [vmem:[%s1072_s0 + $0x10] sm:$0xff] }
   0x3   :  { %629 = vmatpush3.msra.mxu0 %v37_v0  ;;  %664 = vmatpush3.msra.mxu1 %v37_v0  ;;  %v18_v4 = vld [vmem:[%s1072_s0] sm:$0xff]  ;;  %v770_v6 = vld [vmem:[%s1075_s3 + $0x8] sm:$0xff]  ;;  %v784_v10 = vld [vmem:[%s1075_s3 + $0x10] sm:$0xff] }
   0x4   :  { %630 = vmatprep.subr.mxu0 %v36_v1  ;;  %661 = vmatprep.subr.mxu1 %v36_v1  ;;  %v26_v7 = vld [vmem:[%s1072_s0 + $0x40] sm:$0xff]  ;;  %v401_v9 = vmul.f32 %v770_v6, %v770_v6  ;;  %v27_v11 = vld [vmem:[%s1072_s0 + $0x48] sm:$0xff]  ;;  %v28_v12 = vld [vmem:[%s1072_s0 + $0x50] sm:$0xff]  ;;  %v402_v13 = vmul.f32 %v784_v10, %v784_v10 }
   0x5   :  { %631 = vmatpush3.msra.mxu0 %v36_v1  ;;  %665 = vmatpush3.msra.mxu1 %v36_v1  ;;  %v799_v15 = vld [vmem:[%s1075_s3 + $0x18] sm:$0xff]  ;;  %v804_v16 = vld [vmem:[%s1075_s3] sm:$0xff]  ;;  %v809_v17 = vld [vmem:[%s1075_s3 + $0x48] sm:$0xff] }
   0x6   :  { %632 = vmatprep.subr.mxu0 %v35_v2  ;;  %662 = vmatprep.subr.mxu1 %v35_v2  ;;  %v419_v14 = vsel %vm271_vm1, %v401_v9, 0.0  ;;  %v21_v18 = vld [vmem:[%s1072_s0 + $0x18] sm:$0xff]  ;;  %v400_v19 = vmul.f32 %v804_v16, %v804_v16  ;;  %v22_v20 = vld [vmem:[%s1072_s0 + $0x20] sm:$0xff] }
   0x7   :  { %633 = vmatpush3.msra.mxu0 %v35_v2  ;;  %666 = vmatpush3.msra.mxu1 %v35_v2  ;;  %v825_v21 = vld [vmem:[%s1075_s3 + $0x58] sm:$0xff] }
   0x8   :  { %634 = vmatprep.subr.mxu0 %v34_v3  ;;  %636 = vmatprep.mubr.msk.f32.mxu0 %vm45_vm0, %v18_v4 }
   0x9   :  { %635 = vmatpush3.msra.mxu0 %v34_v3  ;;  %663 = vmatprep.subr.mxu1 %v34_v3 }
   0xa   :  { %637 = vmatmul.mubr.msk.f32.vlgmr.msra.gmra.mxu0 %vm45_vm0, %v19_v5  ;;  %667 = vmatpush3.msra.mxu1 %v34_v3 }
   0xb   :  { %648 = vmatprep.mubr.msk.f32.mxu1 %vm45_vm0, %v26_v7  ;;  %639 = vmatprep.mubr.msk.f32.mxu0 %vm45_vm0, %v20_v8 }
   0xc   :  { %649 = vmatmul.mubr.msk.f32.vlgmr.msra.gmra.mxu1 %vm45_vm0, %v27_v11  ;;  %420 = vadd.xlane.f32.xlu1 %v419_v14 }
   0xd   :  { %9 = vsyncpa [#allocation3], 0  ;;  %651 = vmatprep.mubr.msk.f32.mxu1 %vm45_vm0, %v28_v12  ;;  %v29_v22 = vld [vmem:[%s1072_s0 + $0x58] sm:$0xff]  ;;  %v422_v23 = vsel %vm271_vm1, %v402_v13, 0.0  ;;  %v403_v24 = vmul.f32 %v799_v15, %v799_v15  ;;  %v416_v25 = vsel %vm271_vm1, %v400_v19, 0.0  ;;  %v409_v26 = vmul.f32 %v809_v17, %v809_v17  ;;  %v30_v27 = vld [vmem:[%s1072_s0 + $0x60] sm:$0xff] }
   0xe   :  { %640 = vmatmul.mubr.msk.f32.gmra.mxu0 %vm45_vm0, %v21_v18  ;;  %v844_v28 = vld [vmem:[%s1075_s3 + $0x20] sm:$0xff]  ;;  %417 = vadd.xlane.f32.xlu0 %v416_v25  ;;  %v23_v29 = vld [vmem:[%s1072_s0 + $0x28] sm:$0xff]  ;;  %v411_v31 = vmul.f32 %v825_v21, %v825_v21  ;;  %v24_v32 = vld [vmem:[%s1072_s0 + $0x30] sm:$0xff] }
   0xf   :  { %642 = vmatprep.mubr.msk.f32.mxu0 %vm45_vm0, %v22_v20  ;;  %v443_v30 = vsel %vm271_vm1, %v409_v26, 0.0  ;;  %v860_v33 = vld [vmem:[%s1075_s3 + $0x68] sm:$0xff]  ;;  %v425_v35 = vsel %vm271_vm1, %v403_v24, 0.0  ;;  %v404_v36 = vmul.f32 %v844_v28, %v844_v28  ;;  %v32_v37 = vld [vmem:[%s1072_s0 + $0x70] sm:$0xff]  ;;  %v25_v39 = vld [vmem:[%s1072_s0 + $0x38] sm:$0xff] }
  0x10   :  { %652 = vmatmul.mubr.msk.f32.gmra.mxu1 %vm45_vm0, %v29_v22  ;;  %423 = vadd.xlane.f32.xlu1 %v422_v23  ;;  %v31_v34 = vld [vmem:[%s1072_s0 + $0x68] sm:$0xff]  ;;  %v449_v40 = vsel %vm271_vm1, %v411_v31, 0.0  ;;  %v413_v41 = vmul.f32 %v860_v33, %v860_v33  ;;  %v33_v42 = vld [vmem:[%s1072_s0 + $0x78] sm:$0xff]  ;;  %v897_v45 = vld [vmem:[%s1075_s3 + $0x30] sm:$0xff] }
  0x11   :  { %654 = vmatprep.mubr.msk.f32.mxu1 %vm45_vm0, %v30_v27  ;;  %v876_v38 = vld [vmem:[%s1075_s3 + $0x28] sm:$0xff]  ;;  %v428_v43 = vsel %vm271_vm1, %v404_v36, 0.0  ;;  %v406_v48 = vmul.f32 %v897_v45, %v897_v45  ;;  %v907_v49 = vld [vmem:[%s1075_s3 + $0x38] sm:$0xff]  ;;  %v247_v52 = vld [vmem:[%s1075_s3 + $0x40] sm:$0xff] }
  0x12   :  { %643 = vmatmul.mubr.msk.f32.gmra.mxu0 %vm45_vm0, %v23_v29  ;;  %444 = vadd.xlane.f32.xlu0 %v443_v30  ;;  %v405_v44 = vmul.f32 %v876_v38, %v876_v38  ;;  %v455_v46 = vsel %vm271_vm1, %v413_v41, 0.0  ;;  %v407_v51 = vmul.f32 %v907_v49, %v907_v49  ;;  %v408_v54 = vmul.f32 %v247_v52, %v247_v52  ;;  %v919_v55 = vld [vmem:[%s1075_s3 + $0x50] sm:$0xff]  ;;  %v927_v58 = vld [vmem:[%s1075_s3 + $0x60] sm:$0xff]  ;;  %v943_v0 = vld [vmem:[%s1075_s3 + $0x78] sm:$0xff] }
  0x13   :  { %645 = vmatprep.mubr.msk.f32.mxu0 %vm45_vm0, %v24_v32  ;;  %v434_v50 = vsel %vm271_vm1, %v406_v48, 0.0  ;;  %v410_v57 = vmul.f32 %v919_v55, %v919_v55  ;;  %v412_v60 = vmul.f32 %v927_v58, %v927_v58  ;;  %v936_v62 = vld [vmem:[%s1075_s3 + $0x70] sm:$0xff]  ;;  %v415_v2 = vmul.f32 %v943_v0, %v943_v0  ;;  %v952_v4 = vld [vmem:[%s1074_s2] ss:$0 sm:$0xff]  ;;  %s723_s2 = smov [#allocation2]  }
  0x14   :  { %655 = vmatmul.mubr.msk.f32.gmra.mxu1 %vm45_vm0, %v31_v34  ;;  %426 = vadd.xlane.f32.xlu1 %v425_v35  ;;  %v431_v47 = vsel %vm271_vm1, %v405_v44, 0.0  ;;  %v437_v53 = vsel %vm271_vm1, %v407_v51, 0.0  ;;  %v440_v56 = vsel %vm271_vm1, %v408_v54, 0.0  ;;  %v414_v63 = vmul.f32 %v936_v62, %v936_v62  ;;  %s583_s3 = sshll.u32 %s723_s2, 4  ;;  %s584_s3 = int_to_ptr.vmem [resolvable:$true] %s583_s3 }
  0x15   :  { %657 = vmatprep.mubr.msk.f32.mxu1 %vm45_vm0, %v32_v37  ;;  %v446_v59 = vsel %vm271_vm1, %v410_v57, 0.0  ;;  %v452_v61 = vsel %vm271_vm1, %v412_v60, 0.0  ;;  %v461_v3 = vsel %vm271_vm1, %v415_v2, 0.0  ;;  %s701_s7 = scalar_lea.vmem %s584_s3, 16  ;;  %s705_s8 = scalar_lea.vmem %s584_s3, 32 }
  0x16   :  { %646 = vmatmul.mubr.msk.f32.gmra.mxu0 %vm45_vm0, %v25_v39  ;;  %450 = vadd.xlane.f32.xlu0 %v449_v40  ;;  %v458_v1 = vsel %vm271_vm1, %v414_v63, 0.0  ;;  %p702_p0 = scmp.ne.s32.totalorder %s584_s3, %s701_s7  ;;  %p706_p1 = scmp.lt.s32.totalorder %s584_s3, %s584_s3 }
  0x17   :  { %p707_p2 = scmp.lt.s32.totalorder %s705_s8, %s701_s7 }
  0x18   :  { %658 = vmatmul.mubr.msk.f32.gmra.mxu1 %vm45_vm0, %v33_v42  ;;  %429 = vadd.xlane.f32.xlu1 %v428_v43 }
  0x19   :  { %p708_p3 = por %p707_p2, %p706_p1 }
  0x1a   :  { %456 = vadd.xlane.f32.xlu0 %v455_v46 }
  0x1b   :  { %p709_p4 = pnand %p708_p3, %p702_p0 }
  0x1c   :  { %432 = vadd.xlane.f32.xlu1 %v431_v47 }
  0x1e   :  { %462 = vadd.xlane.f32.xlu0 %v461_v3 }
  0x20   :  { %435 = vadd.xlane.f32.xlu1 %v434_v50 }
  0x24   :  { %438 = vadd.xlane.f32.xlu1 %v437_v53 }
  0x28   :  { %441 = vadd.xlane.f32.xlu1 %v440_v56 }
  0x2c   :  { %447 = vadd.xlane.f32.xlu1 %v446_v59 }
  0x30   :  { %453 = vadd.xlane.f32.xlu1 %v452_v61 }
  0x34   :  { %459 = vadd.xlane.f32.xlu1 %v458_v1 }
  0xca   :  { %v638_v5 = vpop.f32.mrf.mxu0 }
  0xcb   :  { %v166_v7 = vadd.f32 %v638_v5, %v952_v4 }
  0xcc   :  { %v160_v8 = vpop.f32.mrf.mxu0  ;;  %v650_v9 = vpop.f32.mrf.mxu1 }
  0xcd   :  { %v161_v11 = vadd.f32 %v952_v4, %v160_v8  ;;  %v957_v12 = vadd.f32 %v650_v9, %v952_v4  ;;  %v321_v13 = vmul.f32 %v166_v7, %v166_v7  ;;  %v256_v31 = vmul.f32 %v770_v6, %v166_v7 }
  0xce   :  { %v200_v14 = vpop.f32.mrf.mxu1  ;;  %v641_v29 = vpop.f32.mrf.mxu0 }
  0xcf   :  { %v201_v18 = vadd.f32 %v952_v4, %v200_v14  ;;  %v339_v19 = vsel %vm271_vm1, %v321_v13, 0.0  ;;  %v320_v20 = vmul.f32 %v161_v11, %v161_v11  ;;  %v329_v22 = vmul.f32 %v957_v12, %v957_v12 }
  0xd0   :  { %340 = vadd.xlane.f32.xlu1 %v339_v19  ;;  %v653_v23 = vpop.f32.mrf.mxu1  ;;  %v255_v32 = vmul.f32 %v804_v16, %v161_v11  ;;  %v176_v35 = vadd.f32 %v641_v29, %v952_v4  ;;  %v275_v39 = vsel %vm271_vm1, %v256_v31, 0.0  ;;  %v170_v41 = vpop.f32.mrf.mxu0 }
  0xd1   :  { %v336_v24 = vsel %vm271_vm1, %v320_v20, 0.0  ;;  %v363_v25 = vsel %vm271_vm1, %v329_v22, 0.0  ;;  %v966_v26 = vadd.f32 %v653_v23, %v952_v4  ;;  %v328_v27 = vmul.f32 %v201_v18, %v201_v18 }
  0xd2   :  { %337 = vadd.xlane.f32.xlu0 %v336_v24  ;;  %v210_v30 = vpop.f32.mrf.mxu1  ;;  %v272_v40 = vsel %vm271_vm1, %v255_v32, 0.0  ;;  %v263_v16 = vmul.f32 %v247_v52, %v201_v18  ;;  %v258_v43 = vmul.f32 %v799_v15, %v176_v35  ;;  %v644_v44 = vpop.f32.mrf.mxu0  ;;  %v323_v47 = vmul.f32 %v176_v35, %v176_v35 }
  0xd3   :  { %v360_v34 = vsel %vm271_vm1, %v328_v27, 0.0  ;;  %v331_v36 = vmul.f32 %v966_v26, %v966_v26  ;;  %v171_v48 = vadd.f32 %v952_v4, %v170_v41  ;;  %v186_v53 = vadd.f32 %v644_v44, %v952_v4 }
  0xd4   :  { %364 = vadd.xlane.f32.xlu1 %v363_v25  ;;  %v656_v37 = vpop.f32.mrf.mxu1  ;;  %v296_v50 = vsel %vm271_vm1, %v263_v16, 0.0  ;;  %v281_v51 = vsel %vm271_vm1, %v258_v43, 0.0  ;;  %v180_v57 = vpop.f32.mrf.mxu0  ;;  %v345_v52 = vsel %vm271_vm1, %v323_v47, 0.0  ;;  %v211_v59 = vadd.f32 %v952_v4, %v210_v30 }
  0xd5   :  { %v369_v6 = vsel %vm271_vm1, %v331_v36, 0.0  ;;  %v226_v42 = vadd.f32 %v656_v37, %v952_v4  ;;  %v322_v15 = vmul.f32 %v171_v48, %v171_v48  ;;  %v260_v63 = vmul.f32 %v876_v38, %v186_v53  ;;  %v421_v47 = vpop.xlane.xlu1 %420 }
  0xd6   :  { %361 = vadd.xlane.f32.xlu0 %v360_v34  ;;  %v220_v46 = vpop.f32.mrf.mxu1  ;;  %v647_v1 = vpop.f32.mrf.mxu0  ;;  %v330_v7 = vmul.f32 %v211_v59, %v211_v59  ;;  %v257_v13 = vmul.f32 %v784_v10, %v171_v48  ;;  %v325_v14 = vmul.f32 %v186_v53, %v186_v53  ;;  %v181_v18 = vadd.f32 %v952_v4, %v180_v57 }
  0xd7   :  { %v333_v54 = vmul.f32 %v226_v42, %v226_v42  ;;  %v342_v2 = vsel %vm271_vm1, %v322_v15, 0.0  ;;  %v287_v3 = vsel %vm271_vm1, %v260_v63, 0.0  ;;  %v196_v5 = vadd.f32 %v647_v1, %v952_v4 }
  0xd8   :  { %276 = vadd.xlane.f32.xlu1 %v275_v39  ;;  %v659_v56 = vpop.f32.mrf.mxu1  ;;  %v366_v9 = vsel %vm271_vm1, %v330_v7, 0.0  ;;  %v278_v19 = vsel %vm271_vm1, %v257_v13, 0.0  ;;  %v351_v22 = vsel %vm271_vm1, %v325_v14, 0.0  ;;  %v264_v23 = vmul.f32 %v809_v17, %v957_v12  ;;  %v190_v37 = vpop.f32.mrf.mxu0 }
  0xd9   :  { %v375_v60 = vsel %vm271_vm1, %v333_v54, 0.0  ;;  %v236_v61 = vadd.f32 %v659_v56, %v952_v4  ;;  %v262_v38 = vmul.f32 %v907_v49, %v196_v5  ;;  %v221_v10 = vadd.f32 %v952_v4, %v220_v46  ;;  %v424_v48 = vpop.xlane.xlu1 %423 }
  0xda   :  { %273 = vadd.xlane.f32.xlu0 %v272_v40  ;;  %v324_v24 = vmul.f32 %v181_v18, %v181_v18  ;;  %v299_v49 = vsel %vm271_vm1, %v264_v23, 0.0  ;;  %v266_v25 = vmul.f32 %v825_v21, %v966_v26  ;;  %v268_v31 = vmul.f32 %v860_v33, %v226_v42 }
  0xdb   :  { %v335_v8 = vmul.f32 %v236_v61, %v236_v61  ;;  %v293_v20 = vsel %vm271_vm1, %v262_v38, 0.0  ;;  %v332_v29 = vmul.f32 %v221_v10, %v221_v10  ;;  %v259_v12 = vmul.f32 %v844_v28, %v181_v18  ;;  %v230_v28 = vpop.f32.mrf.mxu1 }
  0xdc   :  { %370 = vadd.xlane.f32.xlu1 %v369_v6  ;;  %v348_v27 = vsel %vm271_vm1, %v324_v24, 0.0  ;;  %v305_v30 = vsel %vm271_vm1, %v266_v25, 0.0  ;;  %v270_v32 = vmul.f32 %v943_v0, %v236_v61  ;;  %v311_v34 = vsel %vm271_vm1, %v268_v31, 0.0 }
  0xdd   :  { %v381_v11 = vsel %vm271_vm1, %v335_v8, 0.0  ;;  %v372_v17 = vsel %vm271_vm1, %v332_v29, 0.0  ;;  %v327_v21 = vmul.f32 %v196_v5, %v196_v5  ;;  %v284_v26 = vsel %vm271_vm1, %v259_v12, 0.0 }
  0xde   :  { %297 = vadd.xlane.f32.xlu0 %v296_v50  ;;  %v317_v35 = vsel %vm271_vm1, %v270_v32, 0.0  ;;  %v265_v33 = vmul.f32 %v919_v55, %v211_v59  ;;  %v191_v0 = vadd.f32 %v952_v4, %v190_v37  ;;  %v267_v40 = vmul.f32 %v927_v58, %v221_v10  ;;  %v427_v50 = vpop.xlane.xlu1 %426 }
  0xdf   :  { %v357_v36 = vsel %vm271_vm1, %v327_v21, 0.0  ;;  %v231_v41 = vadd.f32 %v952_v4, %v230_v28  ;;  %v467_v25 = vmax.f32 %v427_v50, 1e-16 }
  0xe0   :  { %282 = vadd.xlane.f32.xlu1 %v281_v51  ;;  %v302_v39 = vsel %vm271_vm1, %v265_v33, 0.0  ;;  %v308_v6 = vsel %vm271_vm1, %v267_v40, 0.0  ;;  %v326_v42 = vmul.f32 %v191_v0, %v191_v0  ;;  %v261_v44 = vmul.f32 %v897_v45, %v191_v0  ;;  %v418_v45 = vpop.xlane.xlu0 %417 }
  0xe1   :  { %v334_v16 = vmul.f32 %v231_v41, %v231_v41  ;;  %v269_v46 = vmul.f32 %v936_v62, %v231_v41  ;;  %v464_v7 = vmax.f32 %v418_v45, 1e-16 }
  0xe2   :  { %346 = vadd.xlane.f32.xlu0 %v345_v52  ;;  %v354_v43 = vsel %vm271_vm1, %v326_v42, 0.0  ;;  %v290_v58 = vsel %vm271_vm1, %v261_v44, 0.0  ;;  %v1027_v51 = vpop.xlane.xlu1 %429 }
  0xe3   :  { %v378_v55 = vsel %vm271_vm1, %v334_v16, 0.0  ;;  %v314_v4 = vsel %vm271_vm1, %v269_v46, 0.0  ;;  %v468_v16 = vmax.f32 %v1027_v51, 1e-16 }
  0xe4   :  { %376 = vadd.xlane.f32.xlu1 %v375_v60  ;;  %v1033_v52 = vpop.xlane.xlu0 %444 }
  0xe6   :  { %343 = vadd.xlane.f32.xlu0 %v342_v2  ;;  %v433_v53 = vpop.xlane.xlu1 %432  ;;  %v465_v2 = vmax.f32 %v421_v47, 1e-16 }
  0xe8   :  { %288 = vadd.xlane.f32.xlu1 %v287_v3  ;;  %v1037_v15 = vpop.xlane.xlu0 %450 }
  0xea   :  { %367 = vadd.xlane.f32.xlu0 %v366_v9  ;;  %v1029_v54 = vpop.xlane.xlu1 %435 }
  0xec   :  { %382 = vadd.xlane.f32.xlu1 %v381_v11  ;;  %v1041_v60 = vpop.xlane.xlu0 %456 }
  0xee   :  { %279 = vadd.xlane.f32.xlu0 %v278_v19  ;;  %v1031_v56 = vpop.xlane.xlu1 %438 }
  0xf0   :  { %294 = vadd.xlane.f32.xlu1 %v293_v20  ;;  %v1045_v63 = vpop.xlane.xlu0 %462 }
  0xf2   :  { %352 = vadd.xlane.f32.xlu0 %v351_v22  ;;  %v442_v57 = vpop.xlane.xlu1 %441 }
  0xf3   :  { %v472_v11 = vmax.f32 %v442_v57, 1e-16 }
  0xf4   :  { %300 = vadd.xlane.f32.xlu1 %v299_v49 }
  0xf6   :  { %349 = vadd.xlane.f32.xlu0 %v348_v27  ;;  %v1035_v62 = vpop.xlane.xlu1 %447 }
  0xf8   :  { %306 = vadd.xlane.f32.xlu1 %v305_v30 }
  0xfa   :  { %373 = vadd.xlane.f32.xlu0 %v372_v17  ;;  %v1039_v59 = vpop.xlane.xlu1 %453  ;;  %v466_v17 = vmax.f32 %v424_v48, 1e-16 }
  0xfc   :  { %312 = vadd.xlane.f32.xlu1 %v311_v34 }
  0xfe   :  { %285 = vadd.xlane.f32.xlu0 %v284_v26  ;;  %v1043_v61 = vpop.xlane.xlu1 %459 }
 0x100   :  { %318 = vadd.xlane.f32.xlu1 %v317_v35 }
 0x102   :  { %358 = vadd.xlane.f32.xlu0 %v357_v36 }
 0x106   :  { %303 = vadd.xlane.f32.xlu0 %v302_v39  ;;  %v469_v39 = vmax.f32 %v433_v53, 1e-16 }
 0x10a   :  { %309 = vadd.xlane.f32.xlu0 %v308_v6 }
 0x10e   :  { %355 = vadd.xlane.f32.xlu0 %v354_v43 }
 0x112   :  { %379 = vadd.xlane.f32.xlu0 %v378_v55 }
 0x116   :  { %291 = vadd.xlane.f32.xlu0 %v290_v58 }
 0x11a   :  { %315 = vadd.xlane.f32.xlu0 %v314_v4 }
 0x159   :  { %v341_v1 = vpop.xlane.xlu1 %340 }
 0x15a   :  { %v385_v3 = vmax.f32 %v341_v1, 1e-16 }
 0x15b   :  { %v338_v5 = vpop.xlane.xlu0 %337 }
 0x15c   :  { %v481_v8 = vmul.f32 %v465_v2, %v385_v3  ;;  %v384_v9 = vmax.f32 %v338_v5, 1e-16 }
 0x15d   :  { %v1047_v22 = vpop.xlane.xlu1 %364 }
 0x15e   :  { %v480_v13 = vmul.f32 %v464_v7, %v384_v9  ;;  %669 = vrsqrt.f32 %v481_v8 }
 0x15f   :  { %v362_v38 = vpop.xlane.xlu0 %361 }
 0x160   :  { %671 = vrsqrt.f32 %v480_v13  ;;  %v392_v14 = vmax.f32 %v362_v38, 1e-16  ;;  %v471_v13 = vmax.f32 %v1031_v56, 1e-16 }
 0x161   :  { %v277_v29 = vpop.xlane.xlu1 %276 }
 0x162   :  { %v488_v18 = vmul.f32 %v472_v11, %v392_v14 }
 0x163   :  { %v274_v19 = vpop.xlane.xlu0 %273 }
 0x164   :  { %673 = vrsqrt.f32 %v488_v18  ;;  %v470_v18 = vmax.f32 %v1029_v54, 1e-16 }
 0x165   :  { %v371_v40 = vpop.xlane.xlu1 %370 }
 0x167   :  { %v298_v20 = vpop.xlane.xlu0 %297 }
 0x169   :  { %v283_v58 = vpop.xlane.xlu1 %282 }
 0x16b   :  { %v347_v23 = vpop.xlane.xlu0 %346  ;;  %v670_v10 = vpop.eup %669 }
 0x16c   :  { %v387_v24 = vmax.f32 %v347_v23, 1e-16  ;;  %v513_v12 = vmul.f32 %v670_v10, %v277_v29  ;;  %v393_v10 = vmax.f32 %v1047_v22, 1e-16 }
 0x16d   :  { %v672_v49 = vpop.eup %671  ;;  %v377_v57 = vpop.xlane.xlu1 %376 }
 0x16e   :  { %v512_v27 = vmul.f32 %v672_v49, %v274_v19  ;;  %v483_v30 = vmul.f32 %v467_v25, %v387_v24  ;;  %v529_v33 = vmul.f32 10.0, %v513_v12  ;;  %v473_v24 = vmax.f32 %v1033_v52, 1e-16 }
 0x16f   :  { %v344_v31 = vpop.xlane.xlu0 %343  ;;  %v474_v49 = vmax.f32 %v1035_v62, 1e-16 }
 0x170   :  { %v528_v32 = vmul.f32 10.0, %v512_v27  ;;  %v386_v34 = vmax.f32 %v344_v31, 1e-16  ;;  %675 = vrsqrt.f32 %v483_v30  ;;  %v489_v25 = vmul.f32 %v473_v24, %v393_v10 }
 0x171   :  { %v674_v21 = vpop.eup %673  ;;  %v289_v5 = vpop.xlane.xlu1 %288  ;;  %v395_v30 = vmax.f32 %v371_v40, 1e-16  ;;  %v478_v40 = vmax.f32 %v1043_v61, 1e-16 }
 0x172   :  { %v1049_v26 = vmul.f32 %v674_v21, %v298_v20  ;;  %v482_v35 = vmul.f32 %v466_v17, %v386_v34  ;;  %544 = vxpose.xlu0.b32.start [1/16] (narrow) %v528_v32, 8  ;;  %v475_v17 = vmax.f32 %v1037_v15, 1e-16  ;;  %v476_v21 = vmax.f32 %v1039_v59, 1e-16 }
 0x173   :  { %v368_v36 = vpop.xlane.xlu0 %367 }
 0x174   :  { %677 = vrsqrt.f32 %v482_v35  ;;  %v394_v27 = vmax.f32 %v368_v36, 1e-16  ;;  %v491_v22 = vmul.f32 %v475_v17, %v395_v30 }
 0x175   :  { %v383_v29 = vpop.xlane.xlu1 %382 }
 0x176   :  { %545 = vxpose.xlu0.b32.cont [2/16] (narrow) %v529_v33, 8  ;;  %v490_v31 = vmul.f32 %v474_v49, %v394_v27 }
 0x177   :  { %v280_v37 = vpop.xlane.xlu0 %279 }
 0x179   :  { %v295_v35 = vpop.xlane.xlu1 %294 }
 0x17b   :  { %v353_v28 = vpop.xlane.xlu0 %352 }
 0x17c   :  { %v389_v0 = vmax.f32 %v353_v28, 1e-16  ;;  %v477_v28 = vmax.f32 %v1041_v60, 1e-16 }
 0x17d   :  { %v676_v42 = vpop.eup %675 }
 0x17e   :  { %v485_v41 = vmul.f32 %v469_v39, %v389_v0  ;;  %v515_v48 = vmul.f32 %v676_v42, %v283_v58  ;;  %v301_v39 = vpop.xlane.xlu1 %300 }
 0x17f   :  { %v350_v6 = vpop.xlane.xlu0 %349 }
 0x180   :  { %v388_v43 = vmax.f32 %v350_v6, 1e-16  ;;  %679 = vrsqrt.f32 %v485_v41  ;;  %v531_v45 = vmul.f32 10.0, %v515_v48  ;;  %v536_v6 = vmul.f32 10.0, %v1049_v26 }
 0x181   :  { %v678_v55 = vpop.eup %677 }
 0x182   :  { %v514_v44 = vmul.f32 %v678_v55, %v280_v37  ;;  %v484_v46 = vmul.f32 %v468_v16, %v388_v43  ;;  %v397_v37 = vmax.f32 %v377_v57, 1e-16  ;;  %v399_v43 = vmax.f32 %v383_v29, 1e-16  ;;  %v307_v58 = vpop.xlane.xlu1 %306 }
 0x183   :  { %v374_v4 = vpop.xlane.xlu0 %373 }
 0x184   :  { %v530_v47 = vmul.f32 10.0, %v514_v44  ;;  %681 = vrsqrt.f32 %v484_v46  ;;  %v396_v12 = vmax.f32 %v374_v4, 1e-16  ;;  %v493_v41 = vmul.f32 %v477_v28, %v397_v37 }
 0x185   :  { %v479_v44 = vmax.f32 %v1045_v63, 1e-16 }
 0x186   :  { %546 = vxpose.xlu0.b32.cont [3/16] (narrow) %v530_v47, 8  ;;  %v492_v62 = vmul.f32 %v476_v21, %v396_v12 }
 0x187   :  { %v286_v50 = vpop.xlane.xlu0 %285  ;;  %v495_v4 = vmul.f32 %v479_v44, %v399_v43 }
 0x18a   :  { %547 = vxpose.xlu0.b32.cont [4/16] (narrow) %v531_v45, 8 }
 0x18b   :  { %v359_v53 = vpop.xlane.xlu0 %358 }
 0x18c   :  { %v391_v7 = vmax.f32 %v359_v53, 1e-16  ;;  %v313_v53 = vpop.xlane.xlu1 %312 }
 0x18d   :  { %v680_v2 = vpop.eup %679 }
 0x18e   :  { %v517_v11 = vmul.f32 %v680_v2, %v289_v5  ;;  %v487_v38 = vmul.f32 %v471_v13, %v391_v7 }
 0x18f   :  { %v1052_v1 = vpop.xlane.xlu0 %303 }
 0x190   :  { %v533_v20 = vmul.f32 10.0, %v517_v11  ;;  %683 = vrsqrt.f32 %v487_v38  ;;  %v319_v7 = vpop.xlane.xlu1 %318 }
 0x191   :  { %v682_v51 = vpop.eup %681 }
 0x192   :  { %v516_v3 = vmul.f32 %v682_v51, %v286_v50 }
 0x193   :  { %v1054_v8 = vpop.xlane.xlu0 %309 }
 0x194   :  { %v532_v9 = vmul.f32 10.0, %v516_v3 }
 0x196   :  { %548 = vxpose.xlu0.b32.cont [5/16] (narrow) %v532_v9, 8 }
 0x197   :  { %v356_v14 = vpop.xlane.xlu0 %355 }
 0x198   :  { %v390_v19 = vmax.f32 %v356_v14, 1e-16 }
 0x19a   :  { %v486_v23 = vmul.f32 %v470_v18, %v390_v19  ;;  %549 = vxpose.xlu0.b32.cont [6/16] (narrow) %v533_v20, 8 }
 0x19b   :  { %v380_v56 = vpop.xlane.xlu0 %379 }
 0x19c   :  { %685 = vrsqrt.f32 %v486_v23  ;;  %v398_v0 = vmax.f32 %v380_v56, 1e-16 }
 0x19d   :  { %687 = vrsqrt.f32 %v489_v25  ;;  %v684_v54 = vpop.eup %683 }
 0x19e   :  { %689 = vrsqrt.f32 %v490_v31  ;;  %v519_v36 = vmul.f32 %v684_v54, %v295_v35  ;;  %v494_v16 = vmul.f32 %v478_v40, %v398_v0 }
 0x19f   :  { %v292_v34 = vpop.xlane.xlu0 %291  ;;  %691 = vrsqrt.f32 %v491_v22 }
 0x1a0   :  { %693 = vrsqrt.f32 %v492_v62  ;;  %v535_v15 = vmul.f32 10.0, %v519_v36 }
 0x1a1   :  { %695 = vrsqrt.f32 %v493_v41 }
 0x1a2   :  { %697 = vrsqrt.f32 %v494_v16 }
 0x1a3   :  { %699 = vrsqrt.f32 %v495_v4 }
 0x1a9   :  { %v686_v32 = vpop.eup %685 }
 0x1aa   :  { %v518_v52 = vmul.f32 %v686_v32, %v292_v34  ;;  %v688_v59 = vpop.eup %687 }
 0x1ab   :  { %v521_v42 = vmul.f32 %v688_v59, %v301_v39  ;;  %v690_v55 = vpop.eup %689 }
 0x1ac   :  { %v534_v33 = vmul.f32 10.0, %v518_v52  ;;  %v522_v46 = vmul.f32 %v690_v55, %v1052_v1  ;;  %v692_v61 = vpop.eup %691  ;;  %v316_v1 = vpop.xlane.xlu0 %315 }
 0x1ad   :  { %v537_v60 = vmul.f32 10.0, %v521_v42  ;;  %v523_v47 = vmul.f32 %v692_v61, %v307_v58  ;;  %v694_v50 = vpop.eup %693 }
 0x1ae   :  { %550 = vxpose.xlu0.b32.cont [7/16] (narrow) %v534_v33, 8  ;;  %v538_v48 = vmul.f32 10.0, %v522_v46  ;;  %v524_v45 = vmul.f32 %v694_v50, %v1054_v8  ;;  %v696_v57 = vpop.eup %695 }
 0x1af   :  { %v539_v26 = vmul.f32 10.0, %v523_v47  ;;  %v525_v63 = vmul.f32 %v696_v57, %v313_v53  ;;  %v698_v51 = vpop.eup %697 }
 0x1b0   :  { %v540_v2 = vmul.f32 10.0, %v524_v45  ;;  %v526_v5 = vmul.f32 %v698_v51, %v316_v1  ;;  %v700_v9 = vpop.eup %699 }
 0x1b1   :  { %v541_v3 = vmul.f32 10.0, %v525_v63  ;;  %v527_v11 = vmul.f32 %v700_v9, %v319_v7 }
 0x1b2   :  { %551 = vxpose.xlu0.b32.cont [8/16] (narrow) %v535_v15, 8  ;;  %v542_v13 = vmul.f32 10.0, %v526_v5 }
 0x1b3   :  { %v543_v38 = vmul.f32 10.0, %v527_v11 }
 0x1b6   :  { %552 = vxpose.xlu0.b32.cont [9/16] (narrow) %v536_v6, 8 }
 0x1ba   :  { %553 = vxpose.xlu0.b32.cont [10/16] (narrow) %v537_v60, 8 }
 0x1be   :  { %554 = vxpose.xlu0.b32.cont [11/16] (narrow) %v538_v48, 8 }
 0x1c2   :  { %555 = vxpose.xlu0.b32.cont [12/16] (narrow) %v539_v26, 8 }
 0x1c6   :  { %556 = vxpose.xlu0.b32.cont [13/16] (narrow) %v540_v2, 8 }
 0x1ca   :  { %557 = vxpose.xlu0.b32.cont [14/16] (narrow) %v541_v3, 8 }
 0x1ce   :  { %558 = vxpose.xlu0.b32.cont [15/16] (narrow) %v542_v13, 8 }
 0x1d2   :  { %559 = vxpose.xlu0.b32.end [16/16] (narrow) %v543_v38, 8 }
 0x212   :  { %v560_v8 = vpop.trf.xlu0 }
 0x213   :  { %576 = vst [vmem:[#allocation2] sm:$0x1] %v560_v8 }
 0x214   :  { %712 = shalt.err (!%p709_p4)
}
 0x215   :  { %586 = dma.vmem_to_hbm [thread:$0]  %s584_s3, 16, %s1076_s4, [#allocation3]  }
 0x216   :  { %721 = dma.done.wait [#allocation3], 16  }
 0x217   :  { %722 = vsyncadd [#allocation3], 4294967280 }
 0x218   :  { %590 = vsyncpa [#allocation3], 1 }

// kernel: tpu_custom_call.1
= control target key start
LH: loop header
LB: loop body
LE: loop exit
PB: predicated region body
PF: predicated region fallthrough
CT: control target
= control target key end

     0   :  { %vm45_vm0 = vcmask 261120   ;;  %s625_s0 = inlined_call_operand.vmem [shape: f32[8,32], index: 0, kind: input, shape index: {}]   ;;  %s626_s1 = inlined_call_operand.vmem [shape: f32[32,16], index: 1, kind: input, shape index: {}]   ;;  %s627_s2 = inlined_call_operand.vmem [shape: f32[1,16], index: 2, kind: input, shape index: {}]   ;;  %s628_s3 = inlined_call_operand.vmem [shape: f32[8,16], index: 3, kind: input, shape index: {}]   ;;  %s629_s4 = inlined_call_operand.hbm [shape: f32[1,128], index: 4, kind: output, shape index: {}]  }
   0x1   :  { %v37_v0 = vld [vmem:[%s626_s1 + $0x18] sm:$0xff]  ;;  %v36_v1 = vld [vmem:[%s626_s1 + $0x10] sm:$0xff]  ;;  %v18_v2 = vld [vmem:[%s625_s0] sm:$0xff] }
   0x2   :  { %404 = vmatprep.subr.mxu0 %v37_v0  ;;  %436 = vmatprep.subr.mxu1 %v37_v0  ;;  %v35_v3 = vld [vmem:[%s626_s1 + $0x8] sm:$0xff]  ;;  %v34_v4 = vld [vmem:[%s626_s1] sm:$0xff]  ;;  %v20_v6 = vld [vmem:[%s625_s0 + $0x10] sm:$0xff] }
   0x3   :  { %405 = vmatpush3.msra.mxu0 %v37_v0  ;;  %412 = vmatprep.mubr.msk.f32.mxu0 %vm45_vm0, %v18_v2  ;;  %v19_v5 = vld [vmem:[%s625_s0 + $0x8] sm:$0xff]  ;;  %v26_v7 = vld [vmem:[%s625_s0 + $0x40] sm:$0xff] }
   0x4   :  { %406 = vmatprep.subr.mxu0 %v36_v1  ;;  %440 = vmatpush3.msra.mxu1 %v37_v0 }
   0x5   :  { %407 = vmatpush3.msra.mxu0 %v36_v1  ;;  %437 = vmatprep.subr.mxu1 %v36_v1 }
   0x6   :  { %408 = vmatprep.subr.mxu0 %v35_v3  ;;  %441 = vmatpush3.msra.mxu1 %v36_v1 }
   0x7   :  { %409 = vmatpush3.msra.mxu0 %v35_v3  ;;  %438 = vmatprep.subr.mxu1 %v35_v3 }
   0x8   :  { %410 = vmatprep.subr.mxu0 %v34_v4  ;;  %442 = vmatpush3.msra.mxu1 %v35_v3 }
   0x9   :  { %9 = vsyncpa [#allocation3], 0  ;;  %411 = vmatpush3.msra.mxu0 %v34_v4  ;;  %439 = vmatprep.subr.mxu1 %v34_v4  ;;  %v27_v8 = vld [vmem:[%s625_s0 + $0x48] sm:$0xff]  ;;  %v239_v9 = vld [vmem:[%s628_s3] sm:$0xff] }
   0xa   :  { %413 = vmatmul.mubr.msk.f32.vlgmr.msra.gmra.mxu0 %vm45_vm0, %v19_v5  ;;  %443 = vmatpush3.msra.mxu1 %v34_v4  ;;  %v28_v10 = vld [vmem:[%s625_s0 + $0x50] sm:$0xff]  ;;  %v21_v11 = vld [vmem:[%s625_s0 + $0x18] sm:$0xff]  ;;  %v22_v12 = vld [vmem:[%s625_s0 + $0x20] sm:$0xff] }
   0xb   :  { %415 = vmatprep.mubr.msk.f32.mxu0 %vm45_vm0, %v20_v6  ;;  %424 = vmatprep.mubr.msk.f32.mxu1 %vm45_vm0, %v26_v7  ;;  %v29_v13 = vld [vmem:[%s625_s0 + $0x58] sm:$0xff]  ;;  %v240_v14 = vld [vmem:[%s628_s3 + $0x8] sm:$0xff]  ;;  %v30_v15 = vld [vmem:[%s625_s0 + $0x60] sm:$0xff] }
   0xc   :  { %425 = vmatmul.mubr.msk.f32.vlgmr.msra.gmra.mxu1 %vm45_vm0, %v27_v8  ;;  %287 = vxpose.xlu1.b32.start [1/16] (narrow) %v239_v9, 16  ;;  %v23_v16 = vld [vmem:[%s625_s0 + $0x28] sm:$0xff]  ;;  %v24_v17 = vld [vmem:[%s625_s0 + $0x30] sm:$0xff]  ;;  %v25_v20 = vld [vmem:[%s625_s0 + $0x38] sm:$0xff] }
   0xd   :  { %427 = vmatprep.mubr.msk.f32.mxu1 %vm45_vm0, %v28_v10  ;;  %v31_v18 = vld [vmem:[%s625_s0 + $0x68] sm:$0xff]  ;;  %v32_v19 = vld [vmem:[%s625_s0 + $0x70] sm:$0xff]  ;;  %v33_v21 = vld [vmem:[%s625_s0 + $0x78] sm:$0xff] }
   0xe   :  { %416 = vmatmul.mubr.msk.f32.gmra.mxu0 %vm45_vm0, %v21_v11  ;;  %v241_v22 = vld [vmem:[%s628_s3 + $0x10] sm:$0xff]  ;;  %v242_v23 = vld [vmem:[%s628_s3 + $0x18] sm:$0xff]  ;;  %v243_v24 = vld [vmem:[%s628_s3 + $0x20] sm:$0xff] }
   0xf   :  { %418 = vmatprep.mubr.msk.f32.mxu0 %vm45_vm0, %v22_v12  ;;  %v244_v25 = vld [vmem:[%s628_s3 + $0x28] sm:$0xff]  ;;  %v245_v26 = vld [vmem:[%s628_s3 + $0x30] sm:$0xff]  ;;  %v246_v27 = vld [vmem:[%s628_s3 + $0x38] sm:$0xff] }
  0x10   :  { %428 = vmatmul.mubr.msk.f32.gmra.mxu1 %vm45_vm0, %v29_v13  ;;  %288 = vxpose.xlu1.b32.cont [2/16] (narrow) %v240_v14, 16  ;;  %v247_v28 = vld [vmem:[%s628_s3 + $0x40] sm:$0xff]  ;;  %v248_v29 = vld [vmem:[%s628_s3 + $0x48] sm:$0xff]  ;;  %v249_v30 = vld [vmem:[%s628_s3 + $0x50] sm:$0xff] }
  0x11   :  { %430 = vmatprep.mubr.msk.f32.mxu1 %vm45_vm0, %v30_v15  ;;  %v250_v31 = vld [vmem:[%s628_s3 + $0x58] sm:$0xff]  ;;  %v251_v32 = vld [vmem:[%s628_s3 + $0x60] sm:$0xff]  ;;  %v252_v33 = vld [vmem:[%s628_s3 + $0x68] sm:$0xff] }
  0x12   :  { %419 = vmatmul.mubr.msk.f32.gmra.mxu0 %vm45_vm0, %v23_v16  ;;  %v253_v34 = vld [vmem:[%s628_s3 + $0x70] sm:$0xff]  ;;  %v254_v35 = vld [vmem:[%s628_s3 + $0x78] sm:$0xff]  ;;  %v367_v37 = vld [vmem:[%s627_s2] ss:$0 sm:$0xff]  ;;  %s469_s2 = smov [#allocation2]  }
  0x13   :  { %421 = vmatprep.mubr.msk.f32.mxu0 %vm45_vm0, %v24_v17  ;;  %s359_s3 = sshll.u32 %s469_s2, 4  ;;  %s360_s3 = int_to_ptr.vmem [resolvable:$true] %s359_s3 }
  0x14   :  { %431 = vmatmul.mubr.msk.f32.gmra.mxu1 %vm45_vm0, %v31_v18  ;;  %289 = vxpose.xlu1.b32.cont [3/16] (narrow) %v241_v22, 16  ;;  %s447_s7 = scalar_lea.vmem %s360_s3, 16  ;;  %s451_s8 = scalar_lea.vmem %s360_s3, 32 }
  0x15   :  { %433 = vmatprep.mubr.msk.f32.mxu1 %vm45_vm0, %v32_v19  ;;  %p448_p0 = scmp.ne.s32.totalorder %s360_s3, %s447_s7  ;;  %p452_p1 = scmp.lt.s32.totalorder %s360_s3, %s360_s3 }
  0x16   :  { %422 = vmatmul.mubr.msk.f32.gmra.mxu0 %vm45_vm0, %v25_v20  ;;  %p453_p2 = scmp.lt.s32.totalorder %s451_s8, %s447_s7 }
  0x18   :  { %434 = vmatmul.mubr.msk.f32.gmra.mxu1 %vm45_vm0, %v33_v21  ;;  %290 = vxpose.xlu1.b32.cont [4/16] (narrow) %v242_v23, 16  ;;  %p454_p3 = por %p453_p2, %p452_p1 }
  0x1a   :  { %p455_p4 = pnand %p454_p3, %p448_p0 }
  0x1c   :  { %291 = vxpose.xlu1.b32.cont [5/16] (narrow) %v243_v24, 16 }
  0x20   :  { %292 = vxpose.xlu1.b32.cont [6/16] (narrow) %v244_v25, 16 }
  0x24   :  { %293 = vxpose.xlu1.b32.cont [7/16] (narrow) %v245_v26, 16 }
  0x28   :  { %294 = vxpose.xlu1.b32.cont [8/16] (narrow) %v246_v27, 16 }
  0x2c   :  { %295 = vxpose.xlu1.b32.cont [9/16] (narrow) %v247_v28, 16 }
  0x30   :  { %296 = vxpose.xlu1.b32.cont [10/16] (narrow) %v248_v29, 16 }
  0x34   :  { %297 = vxpose.xlu1.b32.cont [11/16] (narrow) %v249_v30, 16 }
  0x38   :  { %298 = vxpose.xlu1.b32.cont [12/16] (narrow) %v250_v31, 16 }
  0x3c   :  { %299 = vxpose.xlu1.b32.cont [13/16] (narrow) %v251_v32, 16 }
  0x40   :  { %300 = vxpose.xlu1.b32.cont [14/16] (narrow) %v252_v33, 16 }
  0x44   :  { %301 = vxpose.xlu1.b32.cont [15/16] (narrow) %v253_v34, 16 }
  0x48   :  { %302 = vxpose.xlu1.b32.end [16/16] (narrow) %v254_v35, 16 }
  0x88   :  { %v303_v5 = vpop.trf.xlu1 }
  0x89   :  { %v338_v7 = vmul.f32 %v303_v5, %v303_v5 }
  0x8c   :  { %v304_v6 = vpop.trf.xlu1 }
  0x8d   :  { %v339_v8 = vmul.f32 %v304_v6, %v304_v6 }
  0x8f   :  { %v340_v9 = vadd.f32 %v339_v8, %v338_v7 }
  0x91   :  { %v341_v10 = vrot.slane %v340_v9, 4 }
  0x93   :  { %v342_v12 = vadd.f32 %v341_v10, %v340_v9 }
  0x95   :  { %v343_v14 = vrot.slane %v342_v12, 2 }
  0x97   :  { %v344_v18 = vadd.f32 %v343_v14, %v342_v12 }
  0x99   :  { %v345_v23 = vrot.slane %v344_v18, 1 }
  0x9b   :  { %v346_v27 = vadd.f32 %v345_v23, %v344_v18 }
  0x9d   :  { %v347_v31 = vmax.f32 %v346_v27, 1e-16 }
  0xca   :  { %v414_v36 = vpop.f32.mrf.mxu0 }
  0xcb   :  { %v166_v41 = vadd.f32 %v414_v36, %v367_v37 }
  0xcc   :  { %v160_v38 = vpop.f32.mrf.mxu0  ;;  %v426_v52 = vpop.f32.mrf.mxu1 }
  0xcd   :  { %v161_v39 = vadd.f32 %v367_v37, %v160_v38  ;;  %v206_v57 = vadd.f32 %v426_v52, %v367_v37 }
  0xce   :  { %v417_v40 = vpop.f32.mrf.mxu0  ;;  %v200_v54 = vpop.f32.mrf.mxu1 }
  0xcf   :  { %255 = vxpose.xlu0.b32.start [1/16] (narrow) %v161_v39, 16  ;;  %v176_v45 = vadd.f32 %v417_v40, %v367_v37  ;;  %v201_v55 = vadd.f32 %v367_v37, %v200_v54 }
  0xd0   :  { %v170_v42 = vpop.f32.mrf.mxu0  ;;  %v429_v56 = vpop.f32.mrf.mxu1 }
  0xd1   :  { %v171_v43 = vadd.f32 %v367_v37, %v170_v42  ;;  %v216_v61 = vadd.f32 %v429_v56, %v367_v37 }
  0xd2   :  { %v420_v44 = vpop.f32.mrf.mxu0  ;;  %v210_v58 = vpop.f32.mrf.mxu1 }
  0xd3   :  { %256 = vxpose.xlu0.b32.cont [2/16] (narrow) %v166_v41, 16  ;;  %v186_v49 = vadd.f32 %v420_v44, %v367_v37  ;;  %v211_v59 = vadd.f32 %v367_v37, %v210_v58 }
  0xd4   :  { %v180_v46 = vpop.f32.mrf.mxu0  ;;  %v432_v60 = vpop.f32.mrf.mxu1 }
  0xd5   :  { %v181_v47 = vadd.f32 %v367_v37, %v180_v46  ;;  %v226_v1 = vadd.f32 %v432_v60, %v367_v37 }
  0xd6   :  { %v423_v48 = vpop.f32.mrf.mxu0  ;;  %v220_v62 = vpop.f32.mrf.mxu1 }
  0xd7   :  { %257 = vxpose.xlu0.b32.cont [3/16] (narrow) %v171_v43, 16  ;;  %v196_v53 = vadd.f32 %v423_v48, %v367_v37  ;;  %v221_v63 = vadd.f32 %v367_v37, %v220_v62 }
  0xd8   :  { %v190_v50 = vpop.f32.mrf.mxu0  ;;  %v435_v0 = vpop.f32.mrf.mxu1 }
  0xd9   :  { %v191_v51 = vadd.f32 %v367_v37, %v190_v50  ;;  %v236_v4 = vadd.f32 %v435_v0, %v367_v37 }
  0xda   :  { %v230_v2 = vpop.f32.mrf.mxu1 }
  0xdb   :  { %258 = vxpose.xlu0.b32.cont [4/16] (narrow) %v176_v45, 16  ;;  %v231_v3 = vadd.f32 %v367_v37, %v230_v2 }
  0xdf   :  { %259 = vxpose.xlu0.b32.cont [5/16] (narrow) %v181_v47, 16 }
  0xe3   :  { %260 = vxpose.xlu0.b32.cont [6/16] (narrow) %v186_v49, 16 }
  0xe7   :  { %261 = vxpose.xlu0.b32.cont [7/16] (narrow) %v191_v51, 16 }
  0xeb   :  { %262 = vxpose.xlu0.b32.cont [8/16] (narrow) %v196_v53, 16 }
  0xef   :  { %263 = vxpose.xlu0.b32.cont [9/16] (narrow) %v201_v55, 16 }
  0xf3   :  { %264 = vxpose.xlu0.b32.cont [10/16] (narrow) %v206_v57, 16 }
  0xf7   :  { %265 = vxpose.xlu0.b32.cont [11/16] (narrow) %v211_v59, 16 }
  0xfb   :  { %266 = vxpose.xlu0.b32.cont [12/16] (narrow) %v216_v61, 16 }
  0xff   :  { %267 = vxpose.xlu0.b32.cont [13/16] (narrow) %v221_v63, 16 }
 0x103   :  { %268 = vxpose.xlu0.b32.cont [14/16] (narrow) %v226_v1, 16 }
 0x107   :  { %269 = vxpose.xlu0.b32.cont [15/16] (narrow) %v231_v3, 16 }
 0x10b   :  { %270 = vxpose.xlu0.b32.end [16/16] (narrow) %v236_v4, 16 }
 0x14b   :  { %v271_v11 = vpop.trf.xlu0 }
 0x14c   :  { %v328_v15 = vmul.f32 %v271_v11, %v271_v11  ;;  %v319_v21 = vmul.f32 %v303_v5, %v271_v11 }
 0x14f   :  { %v272_v13 = vpop.trf.xlu0 }
 0x150   :  { %v329_v16 = vmul.f32 %v272_v13, %v272_v13  ;;  %v320_v19 = vmul.f32 %v304_v6, %v272_v13 }
 0x152   :  { %v330_v17 = vadd.f32 %v329_v16, %v328_v15  ;;  %v321_v24 = vadd.f32 %v320_v19, %v319_v21 }
 0x154   :  { %v331_v20 = vrot.slane %v330_v17, 4  ;;  %v322_v28 = vrot.slane %v321_v24, 4 }
 0x156   :  { %v332_v22 = vadd.f32 %v331_v20, %v330_v17  ;;  %v323_v32 = vadd.f32 %v322_v28, %v321_v24 }
 0x158   :  { %v333_v25 = vrot.slane %v332_v22, 2  ;;  %v324_v35 = vrot.slane %v323_v32, 2 }
 0x15a   :  { %v334_v26 = vadd.f32 %v333_v25, %v332_v22  ;;  %v325_v36 = vadd.f32 %v324_v35, %v323_v32 }
 0x15c   :  { %v335_v29 = vrot.slane %v334_v26, 1  ;;  %v326_v37 = vrot.slane %v325_v36, 1 }
 0x15e   :  { %v336_v30 = vadd.f32 %v335_v29, %v334_v26  ;;  %v327_v38 = vadd.f32 %v326_v37, %v325_v36 }
 0x160   :  { %v337_v33 = vmax.f32 %v336_v30, 1e-16 }
 0x162   :  { %v348_v34 = vmul.f32 %v347_v31, %v337_v33 }
 0x164   :  { %445 = vrsqrt.f32 %v348_v34 }
 0x171   :  { %v446_v39 = vpop.eup %445 }
 0x172   :  { %v350_v40 = vmul.f32 %v446_v39, %v327_v38 }
 0x174   :  { %v351_v41 = vmul.f32 10.0, %v350_v40 }
 0x176   :  { %352 = vst [vmem:[#allocation2] sm:$0x1] %v351_v41 }
 0x177   :  { %458 = shalt.err (!%p455_p4)
}
 0x178   :  { %362 = dma.vmem_to_hbm [thread:$0]  %s360_s3, 16, %s629_s4, [#allocation3]  }
 0x179   :  { %467 = dma.done.wait [#allocation3], 16  }
 0x17a   :  { %468 = vsyncadd [#allocation3], 4294967280 }
 0x17b   :  { %366 = vsyncpa [#allocation3], 1 }

</bundles_post_ra>
